<compile_context>
chip_gen: v5e
topology: v5e:2x2
jax: 0.10.0
libtpu: 0.0.40
codegen_flags: <defaults>
</compile_context>

<pallas_src>
import functools

import jax
import jax.numpy as jnp
from jax import lax
from jax.experimental import pallas as pl
from jax.experimental.pallas import tpu as pltpu

IN_FEATURES = 13
HIDDEN = 13

# Largest row tile: 16384 x 128 lanes x 4 B = 8 MiB/buffer (16 MiB double-
# buffered) -> fits the v7x 32 MiB scoped VMEM with headroom; v5e/v6e trivially.
_MAX_BLOCK_B = 16384
# Below this, take the whole batch as a single tile (per-step overhead dominates
# long before HBM does at these sizes).
_SINGLE_TILE_B = 8192


def net_kernel(x_ref, w1_ref, b1_ref, w2_ref, b2_ref, o_ref):
    x = x_ref[...]                                            # [tb, 13]
    # fc1, batch-on-lanes: h_t[o, b] = sum_k w1[o, k] * x[b, k]   -> [13, tb]
    h_t = lax.dot_general(
        w1_ref[...], x,
        dimension_numbers=(((1,), (1,)), ((), ())),           # w1 @ x.T
        preferred_element_type=jnp.float32,
    )                                                         # [13, tb]
    # bias is pre-shaped [13, 1] in the wrapper -> column broadcast over lanes.
    h_t = jnp.tanh(h_t + b1_ref[...])                         # lane-dense tanh
    # fc2: y[0, b] = sum_k w2[0, k] * h_t[k, b]   -> lane-dense [1, tb]
    y = lax.dot_general(
        w2_ref[...], h_t,
        dimension_numbers=(((1,), (0,)), ((), ())),           # w2 @ h_t
        preferred_element_type=jnp.float32,
    )
    o_ref[...] = (y + b2_ref[0]).astype(o_ref.dtype)


def _pick_block_b(B):
    """Whole batch for small/medium B; otherwise large 128-aligned tiles
    capped for v7x VMEM, guaranteeing >= 2 grid steps (megacore sharding)."""
    if B <= _SINGLE_TILE_B:
        return B
    bb = min(_MAX_BLOCK_B, pl.cdiv(B, 2))
    return ((bb + 127) // 128) * 128


@functools.partial(jax.jit, static_argnames=("block_b",))
def net_forward_pallas(x, w1, b1, w2, b2, *, block_b=None):
    """Pallas path. x: [B, 13]; w1: [13, 13] torch layout [out, in]; b1: [13];
    w2: [1, 13]; b2: [1].  Returns [B, 1] (same semantics as the torch module)."""
    B, f_in = x.shape
    assert f_in == IN_FEATURES
    if block_b is None:
        block_b = _pick_block_b(B)
    if block_b < B:
        # Tiled path: out block last dim must be a multiple of 128.
        assert block_b % 128 == 0, "tiled block_b must be a multiple of 128"
    grid = (pl.cdiv(B, block_b),)

    # One-off tiny reshape (52 bytes) so the bias broadcasts as a [13, 1] column.
    b1_col = b1.reshape(HIDDEN, 1)

    vmem_full = pl.BlockSpec(memory_space=pltpu.MemorySpace.VMEM)  # resident weights
    smem_full = pl.BlockSpec(memory_space=pltpu.MemorySpace.SMEM)  # scalar bias

    cost = pl.CostEstimate(
        flops=2 * B * HIDDEN * IN_FEATURES + 2 * B * HIDDEN + 2 * B * HIDDEN,
        transcendentals=B * HIDDEN,
        bytes_accessed=4 * (x.size + w1.size + b1.size + w2.size + b2.size + B),
    )

    out_t = pl.pallas_call(
        net_kernel,
        out_shape=jax.ShapeDtypeStruct((1, B), x.dtype),
        grid=grid,
        in_specs=[
            pl.BlockSpec((block_b, IN_FEATURES), lambda i: (i, 0)),  # x row tile
            vmem_full,   # w1 [13, 13]  (torch [out, in] layout, no transpose)
            vmem_full,   # b1 [13, 1]
            vmem_full,   # w2 [1, 13]
            smem_full,   # b2 [1] -> SMEM scalar
        ],
        out_specs=pl.BlockSpec((1, block_b), lambda i: (0, i)),
        compiler_params=pltpu.CompilerParams(
            dimension_semantics=("parallel",),
            vmem_limit_bytes=32 * 1024 * 1024,
        ),
        cost_estimate=cost,
    )(x, w1, b1_col, w2, b2)
    # [1, B] -> [B, 1]: this IS a real (small) relayout under TPU tiled layouts,
    # kept only to preserve the torch module's output shape.
    return out_t.reshape(B, 1)


def net_forward(x, w1, b1, w2, b2):
    """Dispatch: tiny batches are pure launch/step overhead in Pallas, so let a
    single XLA fusion handle them; large batches go to the Pallas kernel."""
    B = x.shape[0]
    if B <= 1024:
        return jnp.tanh(x @ w1.T + b1) @ w2.T + b2
    return net_forward_pallas(x, w1, b1, w2, b2)


def init_params(key):
    """Deterministic init mimicking torch.nn.Linear default U[-1/sqrt(fan_in), +1/sqrt(fan_in)]."""
    k1, k2, k3, k4 = jax.random.split(key, 4)
    bound = 1.0 / jnp.sqrt(13.0)
    w1 = jax.random.uniform(k1, (13, 13), jnp.float32, -bound, bound)  # [out, in]
    b1 = jax.random.uniform(k2, (13,), jnp.float32, -bound, bound)
    w2 = jax.random.uniform(k3, (1, 13), jnp.float32, -bound, bound)   # [out, in]
    b2 = jax.random.uniform(k4, (1,), jnp.float32, -bound, bound)
    return w1, b1, w2, b2


def _reference(x, w1, b1, w2, b2):
    return jnp.tanh(x @ w1.T + b1) @ w2.T + b2


if __name__ == "__main__":
    key = jax.random.PRNGKey(0)
    kx, kp = jax.random.split(key)
    w1, b1, w2, b2 = init_params(kp)

    # 1) Small batch, single tile (whole-batch block).
    B = 8
    x = jax.random.normal(kx, (B, IN_FEATURES), jnp.float32)
    out = jax.block_until_ready(net_forward_pallas(x, w1, b1, w2, b2))
    ref = _reference(x, w1, b1, w2, b2)
    assert out.shape == (B, 1)
    assert jnp.allclose(out, ref, atol=1e-5, rtol=1e-5)

    # 2) Multi-tile path with a ragged last tile (forced small block for test).
    B2 = 300
    x2 = jax.random.normal(jax.random.fold_in(kx, 1), (B2, IN_FEATURES), jnp.float32)
    out2 = jax.block_until_ready(net_forward_pallas(x2, w1, b1, w2, b2, block_b=128))
    ref2 = _reference(x2, w1, b1, w2, b2)
    assert out2.shape == (B2, 1)
    assert jnp.allclose(out2, ref2, atol=1e-5, rtol=1e-5)

    print("KERNEL_OK")
</pallas_src>

<mosaic_0001>
module attributes {stable_mosaic.version = 11 : i64} {
  func.func @net_kernel(%arg0: i32, %arg1: memref<8x13xf32, #tpu.memory_space<vmem>>, %arg2: memref<13x13xf32, #tpu.memory_space<vmem>>, %arg3: memref<13x1xf32, #tpu.memory_space<vmem>>, %arg4: memref<1x13xf32, #tpu.memory_space<vmem>>, %arg5: memref<1xf32, #tpu.memory_space<smem>>, %arg6: memref<1x8xf32, #tpu.memory_space<vmem>>) attributes {dimension_semantics = [#tpu.dimension_semantics<parallel>], iteration_bounds = array<i64: 1>, scalar_prefetch = 0 : i64, scratch_operands = 0 : i64, tpu.core_type = #tpu.core_type<tc>, window_params = [{transform_indices = @transform_0, window_bounds = array<i64: 8, 13>}, {pipeline_mode = #tpu.pipeline_mode<synchronous>, transform_indices = @transform_1, window_bounds = array<i64: 13, 13>}, {pipeline_mode = #tpu.pipeline_mode<synchronous>, transform_indices = @transform_2, window_bounds = array<i64: 13, 1>}, {pipeline_mode = #tpu.pipeline_mode<synchronous>, transform_indices = @transform_3, window_bounds = array<i64: 1, 13>}, {transform_indices = @transform_4, window_bounds = array<i64: 1>}, {transform_indices = @transform_5, window_bounds = array<i64: 1, 8>}]} {
    %c0 = arith.constant 0 : index
    %c0_0 = arith.constant 0 : index
    %0 = vector.load %arg1[%c0, %c0_0] : memref<8x13xf32, #tpu.memory_space<vmem>>, vector<8x13xf32>
    %c0_1 = arith.constant 0 : index
    %c0_2 = arith.constant 0 : index
    %1 = vector.load %arg2[%c0_1, %c0_2] : memref<13x13xf32, #tpu.memory_space<vmem>>, vector<13x13xf32>
    %cst = arith.constant dense<0.000000e+00> : vector<13x8xf32>
    %2 = tpu.matmul %1, %0, %cst {dimension_numbers = #tpu.dot_dimension_numbers<[1], [1], [0], [0], [0, 0, 1, 0], [], []>} : vector<13x13xf32>, vector<8x13xf32>, vector<13x8xf32> -> vector<13x8xf32>
    %c0_3 = arith.constant 0 : index
    %c0_4 = arith.constant 0 : index
    %3 = vector.load %arg3[%c0_3, %c0_4] : memref<13x1xf32, #tpu.memory_space<vmem>>, vector<13x1xf32>
    %4 = vector.broadcast %3 : vector<13x1xf32> to vector<13x8xf32>
    %5 = arith.addf %2, %4 : vector<13x8xf32>
    %6 = math.tanh %5 : vector<13x8xf32>
    %c0_5 = arith.constant 0 : index
    %c0_6 = arith.constant 0 : index
    %7 = vector.load %arg4[%c0_5, %c0_6] : memref<1x13xf32, #tpu.memory_space<vmem>>, vector<1x13xf32>
    %cst_7 = arith.constant dense<0.000000e+00> : vector<1x8xf32>
    %8 = tpu.matmul %7, %6, %cst_7 {dimension_numbers = #tpu.dot_dimension_numbers<[1], [0], [0], [1], [0, 0, 1, 1], [], []>} : vector<1x13xf32>, vector<13x8xf32>, vector<1x8xf32> -> vector<1x8xf32>
    %c0_8 = arith.constant 0 : index
    %9 = memref.load %arg5[%c0_8] : memref<1xf32, #tpu.memory_space<smem>>
    %10 = vector.broadcast %9 : f32 to vector<1x8xf32>
    %11 = arith.addf %8, %10 : vector<1x8xf32>
    %c0_9 = arith.constant 0 : index
    %c0_10 = arith.constant 0 : index
    %12 = vector.load %arg6[%c0_9, %c0_10] : memref<1x8xf32, #tpu.memory_space<vmem>>, vector<1x8xf32>
    tpu.vector_store %arg6[%c0_9, %c0_10], %11 {strides = array<i32>} : memref<1x8xf32, #tpu.memory_space<vmem>>, vector<1x8xf32>,
    return
  }
  func.func @transform_0(%arg0: i32) -> (i32, i32) {
    %c0_i32 = arith.constant 0 : i32
    %c0_i32_0 = arith.constant 0 : i32
    return %arg0, %c0_i32 : i32, i32
  }
  func.func @transform_1(%arg0: i32) -> (i32, i32) {
    %c0_i32 = arith.constant 0 : i32
    %c0_i32_0 = arith.constant 0 : i32
    %c0_i32_1 = arith.constant 0 : i32
    return %c0_i32, %c0_i32_0 : i32, i32
  }
  func.func @transform_2(%arg0: i32) -> (i32, i32) {
    %c0_i32 = arith.constant 0 : i32
    %c0_i32_0 = arith.constant 0 : i32
    %c0_i32_1 = arith.constant 0 : i32
    return %c0_i32, %c0_i32_0 : i32, i32
  }
  func.func @transform_3(%arg0: i32) -> (i32, i32) {
    %c0_i32 = arith.constant 0 : i32
    %c0_i32_0 = arith.constant 0 : i32
    %c0_i32_1 = arith.constant 0 : i32
    return %c0_i32, %c0_i32_0 : i32, i32
  }
  func.func @transform_4(%arg0: i32) -> i32 {
    %c0_i32 = arith.constant 0 : i32
    %c0_i32_0 = arith.constant 0 : i32
    return %c0_i32 : i32
  }
  func.func @transform_5(%arg0: i32) -> (i32, i32) {
    %c0_i32 = arith.constant 0 : i32
    %c0_i32_0 = arith.constant 0 : i32
    return %c0_i32, %arg0 : i32, i32
  }
}

</mosaic_0001>

<bundles_post_ra>
// kernel: net_forward_pallas.1
= control target key start
LH: loop header
LB: loop body
LE: loop exit
PB: predicated region body
PF: predicated region fallthrough
CT: control target
= control target key end

     0   :  { %11 = vsyncpa [#allocation4], 0  ;;  %s263_s0 = inlined_call_operand.hbm [shape: f32[8,13], index: 0, kind: input, shape index: {}]   ;;  %s264_s1 = inlined_call_operand.vmem [shape: f32[13,13], index: 1, kind: input, shape index: {}]   ;;  %s265_s2 = inlined_call_operand.vmem [shape: f32[13,1], index: 2, kind: input, shape index: {}]   ;;  %s266_s3 = inlined_call_operand.vmem [shape: f32[1,13], index: 3, kind: input, shape index: {}]   ;;  %s267_s4 = inlined_call_operand.<no memory space> [shape: f32[1], index: 4, kind: input, shape index: {}]   ;;  %s268_s5 = inlined_call_operand.hbm [shape: f32[1,8], index: 5, kind: output, shape index: {}]  }
   0x1   :  { %12 = vsyncpa [#allocation5], 0  ;;  %s18_s20 = sshll.u32 %s263_s0, 4  ;;  %s201_s21 = smov [#allocation3]   ;;  %s19_s20 = int_to_ptr.hbm [resolvable:$true] %s18_s20 }
   0x2   :  { %s20_s22 = sshll.u32 %s201_s21, 4  ;;  %s21_s22 = int_to_ptr.vmem [resolvable:$true] %s20_s22 }
   0x3   :  { %23 = dma.hbm_to_vmem [thread:$0]  %s19_s20, 128, %s21_s22, [#allocation4]  }
   0x4   :  { %197 = dma.done.wait [#allocation4], 128  }
   0x5   :  { %198 = vsyncadd [#allocation4], 4294967168  ;;  %v202_v0 = vmov 0   ;;  %vm51_vm0 = vcmask 105472   ;;  %v36_v1 = vld [vmem:[#allocation3] sm:$0xff]  ;;  %vm92_vm1 = vcmask 1044480   ;;  %v88_v15 = vstv %s267_s4 }
   0x6   :  { %144 = vset.pattern.permute.xlu0 %v202_v0  ;;  %135 = vmatpush.xpose.msk.msra.mxu0 %vm51_vm0, %v36_v1  ;;  %v37_v2 = vld [vmem:[%s264_s1] sm:$0xff]  ;;  %v38_v3 = vld [vmem:[%s264_s1 + $0x8] sm:$0x1f]  ;;  %s203_s7 = smov [#allocation6]   ;;  %s125_s11 = sshll.u32 %s268_s5, 4  ;;  %vm116_vm2 = vcmask 57344   ;;  %s126_s11 = int_to_ptr.hbm [resolvable:$true] %s125_s11 }
   0x7   :  { %140 = vmatpush.xpose.msk.msra.mxu2 %vm51_vm0, %v36_v1  ;;  %v40_v4 = vld [vmem:[%s265_s2 + $0x8] sm:$0x1f]  ;;  %v39_v5 = vld [vmem:[%s265_s2] sm:$0xff]  ;;  %s123_s8 = sshll.u32 %s203_s7, 4  ;;  %s124_s8 = int_to_ptr.vmem [resolvable:$true] %s123_s8 }
   0x8   :  { %48 = vperm.xlu0 %144, %v40_v4   ;;  %v86_v13 = vld [vmem:[%s266_s3] sm:$0x1] }
   0x9   :  { %136 = vmatmul.msk.f32.vlgmr.msra.gmra.mxu0 %vm51_vm0, %v37_v2 }
   0xa   :  { %137 = vmatmul.msk.f32.vlgmr.msra.gmra.mxu2 %vm51_vm0, %v38_v3 }
  0x10   :  { %43 = vperm.xlu0 %144, %v39_v5  }
  0x7a   :  { %v49_v6 = vpop.permute.xlu0 %48 }
  0x82   :  { %v44_v7 = vpop.permute.xlu0 %43 }
  0x86   :  { %v78_v8 = vpop.f32.mrf.mxu0 }
  0x87   :  { %v79_v10 = vadd.f32 %v78_v8, %v44_v7 }
  0x8d   :  { %v81_v9 = vpop.f32.mrf.mxu2 }
  0x8e   :  { %v82_v11 = vadd.f32 %v81_v9, %v49_v6 }
  0x90   :  { %145 = vtanh.f32 %v82_v11 }
  0x91   :  { %147 = vtanh.f32 %v79_v10 }
  0x96   :  { %v146_v12 = vpop.eup %145 }
  0x97   :  { %138 = vmatpush.msk.msra.mxu1 %vm92_vm1, %v146_v12  ;;  %v148_v14 = vpop.eup %147 }
  0x99   :  { %111 = vmatpush.msra.mxu1 %v148_v14 }
  0x9a   :  { %139 = vmatmul.msk.f32.vlgmr.msra.gmra.mxu1 %vm51_vm0, %v86_v13 }
 0x117   :  { %v113_v16 = vpop.f32.mrf.mxu1 }
 0x118   :  { %v114_v17 = vadd.f32 %v113_v16, %v88_v15 }
 0x11a   :  { %117 = vst.msk [vmem:[#allocation6] sm:$0x1] %vm116_vm2, %v114_v17 }
 0x11b   :  { %128 = dma.vmem_to_hbm [thread:$0]  %s124_s8, 16, %s126_s11, [#allocation5]  }
 0x11c   :  { %199 = dma.done.wait [#allocation5], 16  }
 0x11d   :  { %200 = vsyncadd [#allocation5], 4294967280 }
 0x11e   :  { %133 = vsyncpa [#allocation4], 1 }
 0x11f   :  { %134 = vsyncpa [#allocation5], 1 }

</bundles_post_ra>
